<compile_context>
chip_gen: v7x
topology: tpu7x:2x2x1
jax: 0.10.0
libtpu: 0.0.40
codegen_flags: <defaults>
</compile_context>

<pallas_src>
import jax
import jax.numpy as jnp
from jax import lax
from jax.experimental import pallas as pl
from jax.experimental.pallas import tpu as pltpu

VOXEL_SIZE = (0.2, 0.2, 4.0)
PC_RANGE = (0.0, -40.0, -3.0, 70.4, 40.0, 1.0)
BN_EPS = 1e-3

_TILE_N = 128          # points per block (sublane dim, multiple of 8)
_TILE_M = 8            # voxels per block in the max pass (one sublane tile)
_TILE_M_STATS = 64     # voxels per block in the segment-sum pass
_LANE = 128            # pad feature dim to full lanes -> unmasked vst
_VMEM_LIMIT = 32 * 1024 * 1024


def _voxel_centers(coors_f):
    """Voxel centers from [batch, z, y, x] float coords (pure VPU scale+shift)."""
    vx, vy, vz = VOXEL_SIZE
    x0, y0, z0 = PC_RANGE[0], PC_RANGE[1], PC_RANGE[2]
    return jnp.concatenate(
        [coors_f[:, 3:4] * vx + (vx * 0.5 + x0),
         coors_f[:, 2:3] * vy + (vy * 0.5 + y0),
         coors_f[:, 1:2] * vz + (vz * 0.5 + z0)], axis=-1)


def _segment_sum_kernel(xyz_ref, coors_ref, inv_ref, out_ref):
    """Accumulates per-voxel [sum(dx), sum(dy), sum(dz), count] over N blocks.

    dx/dy/dz are voxel-centered coordinates (small magnitude, MXU friendly).
    Count is fused into the same matmul via an appended ones column.
    """
    mi = pl.program_id(0)
    ni = pl.program_id(1)
    tn = xyz_ref.shape[0]
    tm = out_ref.shape[0]

    @pl.when(ni == 0)
    def _init():
        out_ref[...] = jnp.zeros_like(out_ref)

    rel = xyz_ref[...] - _voxel_centers(coors_ref[...])                    # (tn, 3)
    rel1 = jnp.concatenate([rel, jnp.ones((tn, 1), jnp.float32)], axis=-1)  # (tn, 4)

    # single one-hot; padded points carry inv = -1 and match no column.
    local = inv_ref[...] - mi * tm                                          # (tn, 1)
    onehot = (local == lax.broadcasted_iota(jnp.int32, (tn, tm), 1)
              ).astype(jnp.float32)                                         # (tn, tm)

    # transposed-LHS matmul: (tm, tn) @ (tn, 4), counts fused in.
    out_ref[...] += lax.dot_general(
        onehot, rel1, (((0,), (0,)), ((), ())),
        preferred_element_type=jnp.float32,
        precision=lax.Precision.HIGHEST)


def _vfe_kernel(feats_ref, coors_ref, inv_ref, sums_ref,
                w_ref, scale_ref, shift_ref, out_ref):
    """Point stats + fused Linear/BN/ReLU + streaming per-voxel max."""
    mi = pl.program_id(0)
    ni = pl.program_id(1)
    tn, c = feats_ref.shape
    tm = out_ref.shape[0]

    @pl.when(ni == 0)
    def _init():
        # ReLU makes point feats >= 0, so 0 is both the running-max identity
        # and the guard value for empty / padded voxel rows.
        out_ref[...] = jnp.zeros_like(out_ref)

    raw = feats_ref[...]                                                    # (tn, c)
    xyz = raw[:, 0:3]

    # --- DynamicVFEWithVirtual: rewrite virtual-flag column (index c-2) only
    #     inside the narrow "extra" slab (no full-width pass).
    extra = raw[:, 3:c]                                                     # (tn, c-3)
    is_flag = lax.broadcasted_iota(jnp.int32, extra.shape, 1) == (c - 2 - 3)
    extra = jnp.where(is_flag, jnp.where(extra == -1.0, 1.0, 0.0), extra)

    # --- voxel-center offset (VPU only, no MXU)
    f_center = xyz - _voxel_centers(coors_ref[...])                         # (tn, 3)

    # --- cluster-center offset from pass-1 sums for this voxel tile
    sums = sums_ref[...]                                                    # (tm, 4)
    cnt = jnp.maximum(sums[:, 3:4], 1.0)
    # (pl.reciprocal(cnt, approx=True) would push this onto the EUP; exact
    #  divide over tm=8 rows keeps the accuracy check tight and is negligible.)
    means = sums[:, 0:3] / cnt                                              # (tm, 3)

    # single one-hot for this (N, M) tile: reused for mean map-back + max mask
    local = inv_ref[...] - mi * tm                                          # (tn, 1)
    onehot = (local == lax.broadcasted_iota(jnp.int32, (tn, tm), 1)
              ).astype(jnp.float32)                                         # (tn, tm)

    mean_pp = jnp.dot(onehot, means, preferred_element_type=jnp.float32,
                      precision=lax.Precision.HIGHEST)                      # (tn, 3)
    # points whose voxel lies outside this tile get mean 0 -> wrong f_cluster,
    # but their one-hot column is 0 so they never reach the max below.
    f_cluster = f_center - mean_pp

    # --- one fused Linear(in_feat, F, bias=False) + folded BN + ReLU
    full_in = jnp.concatenate([xyz, f_cluster, f_center, extra], axis=-1)   # (tn, c+6)
    lin = jnp.dot(full_in, w_ref[...], preferred_element_type=jnp.float32,
                  precision=lax.Precision.HIGHEST)                          # (tn, Fp)
    pf = jnp.maximum(lin * scale_ref[...] + shift_ref[...], 0.0)            # (tn, Fp)

    # --- streaming per-voxel max: tm masked column reductions per step,
    #     no (N, M, F) broadcast ever materialized.
    rows = [jnp.max(pf * onehot[:, m:m + 1], axis=0, keepdims=True)
            for m in range(tm)]
    contrib = jnp.concatenate(rows, axis=0)                                 # (tm, Fp)
    out_ref[...] = jnp.maximum(out_ref[...], contrib)


def _scatter_indices(coors, num_voxels):
    """Unique voxel ids + per-point inverse index (host/XLA glue, like Scatter)."""
    gx = int(round((PC_RANGE[3] - PC_RANGE[0]) / VOXEL_SIZE[0]))   # 352
    gy = int(round((PC_RANGE[4] - PC_RANGE[1]) / VOXEL_SIZE[1]))   # 400
    gz = 64  # generous z radix so batch and z can never collide
    c = coors.astype(jnp.int32)
    keys = ((c[:, 0] * gz + c[:, 1]) * gy + c[:, 2]) * gx + c[:, 3]
    # TODO(synk): jnp.unique(size=...) truncates/pads if the true number of
    # voxels != num_voxels; the synthetic test constructs exactly num_voxels.
    _, first_idx, inv = jnp.unique(keys, size=num_voxels,
                                   return_index=True, return_inverse=True)
    return inv.reshape(-1).astype(jnp.int32), first_idx


def dynamic_vfe_with_virtual(features, coors, params, num_voxels):
    """features: (N, C) f32; coors: (N, 4) int [batch, z, y, x]."""
    n, c = features.shape
    in_feat, f = params["w"].shape
    assert in_feat == c + 6, "Linear expects (C-3) extra + 9 stats channels"
    m = num_voxels

    inv, first_idx = _scatter_indices(coors, m)
    voxel_coors = coors[first_idx]

    # --- pad to tile multiples; padded points get inv = -1 (match nothing)
    np_ = -(-n // _TILE_N) * _TILE_N
    m_align = max(_TILE_M, _TILE_M_STATS)
    mp = -(-m // m_align) * m_align
    fp = -(-f // _LANE) * _LANE

    feats_p = jnp.zeros((np_, c), jnp.float32).at[:n].set(
        features.astype(jnp.float32))
    coors_p = jnp.zeros((np_, 4), jnp.float32).at[:n].set(
        coors.astype(jnp.float32))
    inv_p = jnp.full((np_, 1), -1, jnp.int32).at[:n, 0].set(inv)
    xyz_p = feats_p[:, 0:3]

    # --- fold eval-mode BN into scale/shift; pad feature dim to full lanes
    scale = params["gamma"] / jnp.sqrt(params["rvar"] + BN_EPS)
    shift = params["beta"] - params["rmean"] * scale
    w_p = jnp.zeros((in_feat, fp), jnp.float32).at[:, :f].set(params["w"])
    scale_p = jnp.ones((1, fp), jnp.float32).at[0, :f].set(scale)
    shift_p = jnp.zeros((1, fp), jnp.float32).at[0, :f].set(shift)

    nb = np_ // _TILE_N
    mosaic = pltpu.CompilerParams(
        dimension_semantics=("parallel", "arbitrary"),
        vmem_limit_bytes=_VMEM_LIMIT)

    # --- pass 1: per-voxel sums of voxel-centered xyz + counts
    sums = pl.pallas_call(
        _segment_sum_kernel,
        out_shape=jax.ShapeDtypeStruct((mp, 4), jnp.float32),
        grid_spec=pltpu.PrefetchScalarGridSpec(
            num_scalar_prefetch=0,
            grid=(mp // _TILE_M_STATS, nb),
            in_specs=[
                pl.BlockSpec((_TILE_N, 3), lambda mi, ni: (ni, 0)),
                pl.BlockSpec((_TILE_N, 4), lambda mi, ni: (ni, 0)),
                pl.BlockSpec((_TILE_N, 1), lambda mi, ni: (ni, 0)),
            ],
            out_specs=pl.BlockSpec((_TILE_M_STATS, 4), lambda mi, ni: (mi, 0))),
        compiler_params=mosaic,
    )(xyz_p, coors_p, inv_p)

    # --- pass 2: point features + streaming per-voxel max
    out = pl.pallas_call(
        _vfe_kernel,
        out_shape=jax.ShapeDtypeStruct((mp, fp), jnp.float32),
        grid_spec=pltpu.PrefetchScalarGridSpec(
            num_scalar_prefetch=0,
            grid=(mp // _TILE_M, nb),
            in_specs=[
                pl.BlockSpec((_TILE_N, c), lambda mi, ni: (ni, 0)),
                pl.BlockSpec((_TILE_N, 4), lambda mi, ni: (ni, 0)),
                pl.BlockSpec((_TILE_N, 1), lambda mi, ni: (ni, 0)),
                pl.BlockSpec((_TILE_M, 4), lambda mi, ni: (mi, 0)),
                pl.BlockSpec((in_feat, fp), lambda mi, ni: (0, 0)),
                pl.BlockSpec((1, fp), lambda mi, ni: (0, 0)),
                pl.BlockSpec((1, fp), lambda mi, ni: (0, 0)),
            ],
            out_specs=pl.BlockSpec((_TILE_M, fp), lambda mi, ni: (mi, 0))),
        compiler_params=mosaic,
    )(feats_p, coors_p, inv_p, sums, w_p, scale_p, shift_p)

    return out[:m, :f], voxel_coors


def _reference(features, coors, inv, params, m):
    """Pure-JAX reference mirroring the PyTorch forward semantics."""
    vx, vy, vz = VOXEL_SIZE
    x0, y0, z0 = PC_RANGE[0], PC_RANGE[1], PC_RANGE[2]
    n = features.shape[0]

    flag = features[:, -2]
    feats = features.at[:, -2].set(jnp.where(flag == -1.0, 1.0, 0.0))
    xyz = feats[:, :3]
    extra = feats[:, 3:]

    sums = jax.ops.segment_sum(xyz, inv, num_segments=m)
    cnts = jax.ops.segment_sum(jnp.ones((n,), jnp.float32), inv, num_segments=m)
    means = sums / jnp.maximum(cnts, 1.0)[:, None]
    f_cluster = xyz - means[inv]

    cf = coors.astype(jnp.float32)
    centers = jnp.stack([cf[:, 3] * vx + vx / 2 + x0,
                         cf[:, 2] * vy + vy / 2 + y0,
                         cf[:, 1] * vz + vz / 2 + z0], axis=-1)
    f_center = xyz - centers

    full = jnp.concatenate([xyz, f_cluster, f_center, extra], axis=-1)
    lin = jnp.dot(full, params["w"], precision=jax.lax.Precision.HIGHEST)
    bn = (lin - params["rmean"]) / jnp.sqrt(params["rvar"] + BN_EPS) \
        * params["gamma"] + params["beta"]
    pf = jnp.maximum(bn, 0.0)
    return jax.ops.segment_max(pf, inv, num_segments=m)


if __name__ == "__main__":
    N, C_IN, M, F = 256, 5, 64, 32          # in_channels=5, feat_channels=(32,)
    IN_FEAT = (C_IN - 3) + 9                # 11

    key = jax.random.PRNGKey(0)
    k_w, k_g, k_b, k_m, k_v, k_inv, k_u, k_flag, k_int = jax.random.split(key, 9)

    # --- deterministic synthetic parameters (no checkpoint load)
    params = dict(
        w=0.1 * jax.random.normal(k_w, (IN_FEAT, F), jnp.float32),
        gamma=1.0 + 0.1 * jax.random.normal(k_g, (F,), jnp.float32),
        beta=0.05 * jax.random.normal(k_b, (F,), jnp.float32),
        rmean=0.01 * jax.random.normal(k_m, (F,), jnp.float32),
        rvar=1.0 + 0.1 * jax.random.uniform(k_v, (F,), jnp.float32),
    )

    # --- M distinct voxel coords [batch, z, y, x] and point -> voxel ids
    m_ids = jnp.arange(M, dtype=jnp.int32)
    base_coors = jnp.stack([m_ids % 2, jnp.zeros_like(m_ids), m_ids % 400,
                            (m_ids * 5) % 352], axis=-1)
    point_vox = jnp.concatenate(
        [m_ids, jax.random.randint(k_inv, (N - M,), 0, M, jnp.int32)])
    coors = base_coors[point_vox]                                     # (N, 4)

    # --- points inside their voxel + [virtual flag, intensity] extra channels
    u = jax.random.uniform(k_u, (N, 3), jnp.float32)
    cf = coors.astype(jnp.float32)
    px = (cf[:, 3] + u[:, 0]) * VOXEL_SIZE[0] + PC_RANGE[0]
    py = (cf[:, 2] + u[:, 1]) * VOXEL_SIZE[1] + PC_RANGE[1]
    pz = (cf[:, 1] + u[:, 2]) * VOXEL_SIZE[2] + PC_RANGE[2]
    flag_raw = jnp.where(jax.random.bernoulli(k_flag, 0.3, (N,)), -1.0, 0.0)
    intensity = jax.random.uniform(k_int, (N,), jnp.float32)
    features = jnp.stack([px, py, pz, flag_raw, intensity], axis=-1)  # (N, 5)

    voxel_feats, voxel_coors = dynamic_vfe_with_virtual(features, coors, params, M)
    voxel_feats = jax.block_until_ready(voxel_feats)
    voxel_coors = jax.block_until_ready(voxel_coors)

    # --- check against the pure-JAX reference (same scatter indices)
    inv_chk, _ = _scatter_indices(coors, M)
    ref = _reference(features, coors, inv_chk, params, M)
    err = float(jnp.max(jnp.abs(voxel_feats - ref)))
    assert voxel_feats.shape == (M, F) and voxel_coors.shape == (M, 4)
    assert err < 5e-3, f"mismatch vs reference: max abs err {err}"
    print("KERNEL_OK")
</pallas_src>

<mosaic_0001>
module attributes {stable_mosaic.version = 11 : i64} {
  func.func @_segment_sum_kernel(%arg0: i32, %arg1: i32, %arg2: memref<128x3xf32, #tpu.memory_space<vmem>>, %arg3: memref<128x4xf32, #tpu.memory_space<vmem>>, %arg4: memref<128x1xi32, #tpu.memory_space<vmem>>, %arg5: memref<64x4xf32, #tpu.memory_space<vmem>>) attributes {dimension_semantics = [#tpu.dimension_semantics<parallel>, #tpu.dimension_semantics<arbitrary>], iteration_bounds = array<i64: 1, 2>, scalar_prefetch = 0 : i64, scratch_operands = 0 : i64, tpu.core_type = #tpu.core_type<tc>, window_params = [{transform_indices = @transform_0, window_bounds = array<i64: 128, 3>}, {transform_indices = @transform_1, window_bounds = array<i64: 128, 4>}, {transform_indices = @transform_2, window_bounds = array<i64: 128, 1>}, {transform_indices = @transform_3, window_bounds = array<i64: 64, 4>}]} {
    %c0_i32 = arith.constant 0 : i32
    %0 = arith.cmpi eq, %arg1, %c0_i32 : i32
    %1 = arith.extui %0 : i1 to i32
    %c0_i32_0 = arith.constant 0 : i32
    %2 = arith.cmpi ne, %1, %c0_i32_0 : i32
    scf.if %2 {
      %cst_17 = arith.constant 0.000000e+00 : f32
      %37 = vector.broadcast %cst_17 : f32 to vector<64x4xf32>
      %c0_18 = arith.constant 0 : index
      %c0_19 = arith.constant 0 : index
      %38 = vector.load %arg5[%c0_18, %c0_19] : memref<64x4xf32, #tpu.memory_space<vmem>>, vector<64x4xf32>
      tpu.vector_store %arg5[%c0_18, %c0_19], %37 {strides = array<i32>} : memref<64x4xf32, #tpu.memory_space<vmem>>, vector<64x4xf32>,
    } else {
    }
    %c0 = arith.constant 0 : index
    %c0_1 = arith.constant 0 : index
    %3 = vector.load %arg2[%c0, %c0_1] : memref<128x3xf32, #tpu.memory_space<vmem>>, vector<128x3xf32>
    %c0_2 = arith.constant 0 : index
    %c0_3 = arith.constant 0 : index
    %4 = vector.load %arg3[%c0_2, %c0_3] : memref<128x4xf32, #tpu.memory_space<vmem>>, vector<128x4xf32>
    %5 = vector.extract_strided_slice %4 {offsets = [0, 3], sizes = [128, 1], strides = [1, 1]} : vector<128x4xf32> to vector<128x1xf32>
    %cst = arith.constant 2.000000e-01 : f32
    %6 = vector.broadcast %cst : f32 to vector<128x1xf32>
    %7 = arith.mulf %5, %6 : vector<128x1xf32>
    %cst_4 = arith.constant 1.000000e-01 : f32
    %8 = vector.broadcast %cst_4 : f32 to vector<128x1xf32>
    %9 = arith.addf %7, %8 : vector<128x1xf32>
    %10 = vector.extract_strided_slice %4 {offsets = [0, 2], sizes = [128, 1], strides = [1, 1]} : vector<128x4xf32> to vector<128x1xf32>
    %cst_5 = arith.constant 2.000000e-01 : f32
    %11 = vector.broadcast %cst_5 : f32 to vector<128x1xf32>
    %12 = arith.mulf %10, %11 : vector<128x1xf32>
    %cst_6 = arith.constant -3.990000e+01 : f32
    %13 = vector.broadcast %cst_6 : f32 to vector<128x1xf32>
    %14 = arith.addf %12, %13 : vector<128x1xf32>
    %15 = vector.extract_strided_slice %4 {offsets = [0, 1], sizes = [128, 1], strides = [1, 1]} : vector<128x4xf32> to vector<128x1xf32>
    %cst_7 = arith.constant 4.000000e+00 : f32
    %16 = vector.broadcast %cst_7 : f32 to vector<128x1xf32>
    %17 = arith.mulf %15, %16 : vector<128x1xf32>
    %cst_8 = arith.constant -1.000000e+00 : f32
    %18 = vector.broadcast %cst_8 : f32 to vector<128x1xf32>
    %19 = arith.addf %17, %18 : vector<128x1xf32>
    %20 = tpu.concatenate %9, %14, %19 in 1 : vector<128x1xf32>, vector<128x1xf32>, vector<128x1xf32> -> vector<128x3xf32>
    %21 = arith.subf %3, %20 : vector<128x3xf32>
    %cst_9 = arith.constant 1.000000e+00 : f32
    %22 = vector.broadcast %cst_9 : f32 to vector<128x1xf32>
    %23 = tpu.concatenate %21, %22 in 1 : vector<128x3xf32>, vector<128x1xf32> -> vector<128x4xf32>
    %c0_10 = arith.constant 0 : index
    %c0_11 = arith.constant 0 : index
    %24 = vector.load %arg4[%c0_10, %c0_11] : memref<128x1xi32, #tpu.memory_space<vmem>>, vector<128x1xi32>
    %c64_i32 = arith.constant 64 : i32
    %25 = arith.muli %arg0, %c64_i32 : i32
    %26 = vector.broadcast %25 : i32 to vector<128x1xi32>
    %27 = arith.subi %24, %26 : vector<128x1xi32>
    %28 = tpu.iota {dimensions = array<i32: 1>} : vector<128x64xi32>
    %29 = vector.broadcast %27 : vector<128x1xi32> to vector<128x64xi32>
    %30 = arith.cmpi eq, %29, %28 : vector<128x64xi32>
    %31 = arith.extui %30 : vector<128x64xi1> to vector<128x64xi32>
    %32 = arith.sitofp %31 : vector<128x64xi32> to vector<128x64xf32>
    %c0_12 = arith.constant 0 : index
    %c0_13 = arith.constant 0 : index
    %33 = vector.load %arg5[%c0_12, %c0_13] : memref<64x4xf32, #tpu.memory_space<vmem>>, vector<64x4xf32>
    %cst_14 = arith.constant dense<0.000000e+00> : vector<64x4xf32>
    %34 = tpu.matmul %32, %23, %cst_14 {dimension_numbers = #tpu.dot_dimension_numbers<[0], [0], [1], [1], [0, 1, 1, 1], [], []>, precision = #tpu.contract_precision<fp32>} : vector<128x64xf32>, vector<128x4xf32>, vector<64x4xf32> -> vector<64x4xf32>
    %35 = arith.addf %33, %34 : vector<64x4xf32>
    %c0_15 = arith.constant 0 : index
    %c0_16 = arith.constant 0 : index
    %36 = vector.load %arg5[%c0_15, %c0_16] : memref<64x4xf32, #tpu.memory_space<vmem>>, vector<64x4xf32>
    tpu.vector_store %arg5[%c0_15, %c0_16], %35 {strides = array<i32>} : memref<64x4xf32, #tpu.memory_space<vmem>>, vector<64x4xf32>,
    return
  }
  func.func @transform_0(%arg0: i32, %arg1: i32) -> (i32, i32) {
    %c0_i32 = arith.constant 0 : i32
    %c0_i32_0 = arith.constant 0 : i32
    return %arg1, %c0_i32 : i32, i32
  }
  func.func @transform_1(%arg0: i32, %arg1: i32) -> (i32, i32) {
    %c0_i32 = arith.constant 0 : i32
    %c0_i32_0 = arith.constant 0 : i32
    return %arg1, %c0_i32 : i32, i32
  }
  func.func @transform_2(%arg0: i32, %arg1: i32) -> (i32, i32) {
    %c0_i32 = arith.constant 0 : i32
    %c0_i32_0 = arith.constant 0 : i32
    return %arg1, %c0_i32 : i32, i32
  }
  func.func @transform_3(%arg0: i32, %arg1: i32) -> (i32, i32) {
    %c0_i32 = arith.constant 0 : i32
    %c0_i32_0 = arith.constant 0 : i32
    return %arg0, %c0_i32 : i32, i32
  }
}

</mosaic_0001>

<bundles_post_ra>
// kernel: tpu_custom_call.1
= control target key start
LH: loop header
LB: loop body
LE: loop exit
PB: predicated region body
PF: predicated region fallthrough
CT: control target
= control target key end

     0   :  { %s2584_s12 = smov 0   ;;  %s2586_s13 = smov 0   ;;  %s3160_s0 = inlined_call_operand.vmem [shape: f32[256,3], index: 0, kind: input, shape index: {}]   ;;  %s3161_s1 = inlined_call_operand.vmem [shape: f32[256,4], index: 1, kind: input, shape index: {}]   ;;  %s3162_s2 = inlined_call_operand.vmem [shape: s32[256,1], index: 2, kind: input, shape index: {}]   ;;  %s3163_s3 = inlined_call_operand.vmem [shape: f32[64,4], index: 3, kind: output, shape index: {}]  }
   0x1   :  { %s2588_s14 = smov 0  }
   0x2 LB: > { %s22_s15 = sadd.s32 1, %s2552_s13  ;;  %p1834_p0 = scmp.ge.s32.totalorder %s2556_s14, 1  ;;  %s2556_s14 = sphi %s2588_s14, %s13_s14   ;;  %s2552_s13 = sphi %s2586_s13, %s3165_s13   ;;  %s2548_s12 = sphi %s2584_s12, %s3164_s12  }
   0x3   : > { %p23_p1 = scmp.ge.s32.totalorder %s22_s15, 2  ;;  %p172_p2 = scmp.lt.s32.totalorder %s2556_s14, 3 }
   0x5   : > { %s3167_s15 = smov (%p23_p1, %s22_s15), 0  ;;  %p173_p3 = pnand %p1834_p0, %p172_p2 }
   0x6   : > { %s1835_s16 = sshll.u32 (!%p173_p3), %s2548_s12, 4  ;;  %p1841_p5 = scmp.ne.s32.totalorder (!%p173_p3), %s2548_s12, 0 }
   0x7   : > { %176 = sbr.rel (%p173_p3) target bundleno = 614 (0x266), region = 32  ;;  %p207_p4 = scmp.lt.s32.totalorder (!%p173_p3), %s1835_s16, 31 }
   0xe   : > { %s3169_s16 = smov (!%p207_p4, %s1835_s16), 31  ;;  %233 = sbr.rel (%p1841_p5) target bundleno = 21 (0x15), region = 36 }
   0xf   : > { %s1836_s17 = sshll.u32 %s3169_s16, 3  ;;  %vm234_vm0 = vcmask (!%p1841_p5), 31744   ;;  %v2558_v0 = vmov (!%p1841_p5), 0.0  }
  0x10   : > { %s2605_s20 = scalar_lea.vmem %s3160_s0, %s1836_s17  ;;  %s2610_s23 = scalar_lea.vmem %s3161_s1, %s1836_s17  ;;  %235 = vst.msk [vmem:[%s3163_s3] sm:$0xff] (!%p1841_p5), %vm234_vm0, %v2558_v0  ;;  %236 = vst.msk [vmem:[%s3163_s3 + $0x8] sm:$0xff] (!%p1841_p5), %vm234_vm0, %v2558_v0 }
  0x11   : > { %s2615_s26 = scalar_lea.vmem %s3162_s2, %s1836_s17  ;;  %237 = vst.msk [vmem:[%s3163_s3 + $0x10] sm:$0xff] (!%p1841_p5), %vm234_vm0, %v2558_v0  ;;  %238 = vst.msk [vmem:[%s3163_s3 + $0x18] sm:$0xff] (!%p1841_p5), %vm234_vm0, %v2558_v0 }
  0x12   : > { %239 = vst.msk [vmem:[%s3163_s3 + $0x20] sm:$0xff] (!%p1841_p5), %vm234_vm0, %v2558_v0  ;;  %240 = vst.msk [vmem:[%s3163_s3 + $0x28] sm:$0xff] (!%p1841_p5), %vm234_vm0, %v2558_v0 }
  0x13   : > { %241 = vst.msk [vmem:[%s3163_s3 + $0x30] sm:$0xff] (!%p1841_p5), %vm234_vm0, %v2558_v0  ;;  %242 = vst.msk [vmem:[%s3163_s3 + $0x38] sm:$0xff] (!%p1841_p5), %vm234_vm0, %v2558_v0 }
  0x15 PF: > { %v616_v1 = vld [vmem:[%s2615_s26 + $0x10] sm:$0xff]  ;;  %v614_v2 = vld [vmem:[%s2615_s26] sm:$0xff]  ;;  %v2559_v3 = vmov 0   ;;  %v617_v4 = vld [vmem:[%s2615_s26 + $0x18] sm:$0xff]  ;;  %s2560_s19 = smov 125   ;;  %s2561_s21 = smov 127  }
  0x16   : > { %2533 = vset.pattern.permute.xlu1 %v2559_v3  ;;  %2532 = vset.pattern.permute.xlu0 %v2559_v3  ;;  %v615_v5 = vld [vmem:[%s2615_s26 + $0x8] sm:$0xff]  ;;  %v618_v7 = vld [vmem:[%s2615_s26 + $0x20] sm:$0xff]  ;;  %v621_v8 = vld [vmem:[%s2615_s26 + $0x38] sm:$0xff]  ;;  %s2562_s22 = smov 1   ;;  %vm547_vm5 = vcmask 7168   ;;  %vm564_vm6 = vcmask 15360  }
  0x17   : > { %657 = vperm.xlu1 %2533, %v616_v1   ;;  %651 = vperm.xlu0 %2532, %v614_v2   ;;  %v619_v6 = vld [vmem:[%s2615_s26 + $0x28] sm:$0xff]  ;;  %v620_v9 = vld [vmem:[%s2615_s26 + $0x30] sm:$0xff]  ;;  %v622_v11 = vld [vmem:[%s2615_s26 + $0x40] sm:$0xff]  ;;  %vm597_vm8 = vcmask 23552  }
  0x18   : > { %v623_v10 = vld [vmem:[%s2615_s26 + $0x48] sm:$0xff]  ;;  %v625_v12 = vld [vmem:[%s2615_s26 + $0x58] sm:$0xff]  ;;  %v624_v13 = vld [vmem:[%s2615_s26 + $0x50] sm:$0xff] }
  0x19   : > { %v627_v14 = vld [vmem:[%s2615_s26 + $0x68] sm:$0xff]  ;;  %v626_v15 = vld [vmem:[%s2615_s26 + $0x60] sm:$0xff]  ;;  %v629_v20 = vld [vmem:[%s2615_s26 + $0x78] sm:$0xff] }
  0x1a   : > { %v259_v16 = vld [vmem:[%s2610_s23] sm:$0xff]  ;;  %v260_v17 = vld [vmem:[%s2610_s23 + $0x8] sm:$0xff]  ;;  %v628_v21 = vld [vmem:[%s2615_s26 + $0x70] sm:$0xff] }
  0x1b   : > { %660 = vperm.xlu1 %2533, %v617_v4   ;;  %654 = vperm.xlu0 %2532, %v615_v5   ;;  %v275_v18 = vmul.f32 0.2, %v259_v16  ;;  %v276_v19 = vmul.f32 0.2, %v260_v17  ;;  %v323_v25 = vmul.f32 4.0, %v259_v16  ;;  %v324_v27 = vmul.f32 4.0, %v260_v17 }
  0x1c   : > { %v261_v28 = vld [vmem:[%s2610_s23 + $0x10] sm:$0xff]  ;;  %v262_v29 = vld [vmem:[%s2610_s23 + $0x18] sm:$0xff]  ;;  %v263_v40 = vld [vmem:[%s2610_s23 + $0x20] sm:$0xff] }
  0x1d   : > { %v291_v22 = vadd.f32 0.1, %v275_v18  ;;  %v292_v23 = vadd.f32 0.1, %v276_v19  ;;  %v307_v24 = vadd.f32 -39.9, %v275_v18 }
  0x1e   : > { %v308_v26 = vadd.f32 -39.9, %v276_v19  ;;  %v339_v30 = vadd.f32 -1.0, %v323_v25  ;;  %v277_v31 = vmul.f32 0.2, %v261_v28  ;;  %v340_v32 = vadd.f32 -1.0, %v324_v27 }
  0x1f   : > { %666 = vperm.xlu1 %2533, %v619_v6   ;;  %663 = vperm.xlu0 %2532, %v618_v7   ;;  %v278_v33 = vmul.f32 0.2, %v262_v29  ;;  %v325_v37 = vmul.f32 4.0, %v261_v28  ;;  %v326_v39 = vmul.f32 4.0, %v262_v29  ;;  %v264_v41 = vld [vmem:[%s2610_s23 + $0x28] sm:$0xff]  ;;  %v327_v49 = vmul.f32 4.0, %v263_v40 }
  0x20   : > { %v293_v34 = vadd.f32 0.1, %v277_v31  ;;  %v309_v36 = vadd.f32 -39.9, %v277_v31  ;;  %v279_v43 = vmul.f32 0.2, %v263_v40 }
  0x21   : > { %v294_v35 = vadd.f32 0.1, %v278_v33  ;;  %v310_v38 = vadd.f32 -39.9, %v278_v33  ;;  %v341_v42 = vadd.f32 -1.0, %v325_v37  ;;  %v342_v44 = vadd.f32 -1.0, %v326_v39 }
  0x22   : > { %v280_v45 = vmul.f32 0.2, %v264_v41  ;;  %v295_v46 = vadd.f32 0.1, %v279_v43  ;;  %v311_v48 = vadd.f32 -39.9, %v279_v43 }
  0x23   : > { %672 = vperm.xlu1 %2533, %v621_v8   ;;  %669 = vperm.xlu0 %2532, %v620_v9   ;;  %v328_v51 = vmul.f32 4.0, %v264_v41  ;;  %v265_v52 = vld [vmem:[%s2610_s23 + $0x30] sm:$0xff]  ;;  %v266_v53 = vld [vmem:[%s2610_s23 + $0x38] sm:$0xff]  ;;  %v343_v54 = vadd.f32 -1.0, %v327_v49  ;;  %v267_v0 = vld [vmem:[%s2610_s23 + $0x40] sm:$0xff] }
  0x24   : > { %v296_v47 = vadd.f32 0.1, %v280_v45  ;;  %v312_v50 = vadd.f32 -39.9, %v280_v45  ;;  %v281_v55 = vmul.f32 0.2, %v265_v52 }
  0x25   : > { %v344_v56 = vadd.f32 -1.0, %v328_v51  ;;  %v282_v57 = vmul.f32 0.2, %v266_v53  ;;  %v329_v61 = vmul.f32 4.0, %v265_v52  ;;  %v330_v63 = vmul.f32 4.0, %v266_v53  ;;  %v268_v1 = vld [vmem:[%s2610_s23 + $0x48] sm:$0xff] }
  0x26   : > { %v297_v58 = vadd.f32 0.1, %v281_v55  ;;  %v313_v60 = vadd.f32 -39.9, %v281_v55  ;;  %v283_v3 = vmul.f32 0.2, %v267_v0 }
  0x27   : > { %678 = vperm.xlu1 %2533, %v623_v10   ;;  %675 = vperm.xlu0 %2532, %v622_v11   ;;  %v298_v59 = vadd.f32 0.1, %v282_v57  ;;  %v314_v62 = vadd.f32 -39.9, %v282_v57  ;;  %v345_v2 = vadd.f32 -1.0, %v329_v61  ;;  %v346_v4 = vadd.f32 -1.0, %v330_v63 }
  0x28   : > { %v284_v5 = vmul.f32 0.2, %v268_v1  ;;  %v299_v6 = vadd.f32 0.1, %v283_v3  ;;  %v315_v8 = vadd.f32 -39.9, %v283_v3 }
  0x29   : > { %v331_v9 = vmul.f32 4.0, %v267_v0  ;;  %v332_v11 = vmul.f32 4.0, %v268_v1  ;;  %v272_v25 = vld [vmem:[%s2610_s23 + $0x68] sm:$0xff]  ;;  %v274_v37 = vld [vmem:[%s2610_s23 + $0x78] sm:$0xff] }
  0x2a   : > { %v300_v7 = vadd.f32 0.1, %v284_v5  ;;  %v316_v10 = vadd.f32 -39.9, %v284_v5  ;;  %v288_v29 = vmul.f32 0.2, %v272_v25 }
  0x2b   : > { %684 = vperm.xlu1 %2533, %v625_v12   ;;  %681 = vperm.xlu0 %2532, %v624_v13   ;;  %v269_v12 = vld [vmem:[%s2610_s23 + $0x50] sm:$0xff]  ;;  %v270_v13 = vld [vmem:[%s2610_s23 + $0x58] sm:$0xff]  ;;  %v348_v16 = vadd.f32 -1.0, %v332_v11  ;;  %v290_v41 = vmul.f32 0.2, %v274_v37 }
  0x2c   : > { %v286_v17 = vmul.f32 0.2, %v270_v13  ;;  %v304_v31 = vadd.f32 0.1, %v288_v29 }
  0x2d   : > { %v306_v43 = vadd.f32 0.1, %v290_v41 }
  0x2e   : > { %v302_v19 = vadd.f32 0.1, %v286_v17 }
  0x2f   : > { %690 = vperm.xlu1 %2533, %v627_v14   ;;  %687 = vperm.xlu0 %2532, %v626_v15   ;;  %v347_v14 = vadd.f32 -1.0, %v331_v9  ;;  %v285_v15 = vmul.f32 0.2, %v269_v12 }
  0x31   : > { %v301_v18 = vadd.f32 0.1, %v285_v15 }
  0x33   : > { %696 = vperm.xlu1 %2533, %v629_v20   ;;  %693 = vperm.xlu0 %2532, %v628_v21   ;;  %v317_v20 = vadd.f32 -39.9, %v285_v15  ;;  %v333_v21 = vmul.f32 4.0, %v269_v12  ;;  %v243_v15 = vld [vmem:[%s2605_s20] sm:$0xff] }
  0x37   : > { %371 = vrot.lane.b32.xlu0 %v291_v22, %s2560_s19  ;;  %373 = vrot.lane.b32.xlu1 %v292_v23, %s2560_s19  ;;  %v318_v22 = vadd.f32 -39.9, %v286_v17  ;;  %v334_v23 = vmul.f32 4.0, %v270_v13 }
  0x39   : > { %v350_v28 = vadd.f32 -1.0, %v334_v23 }
  0x3b   : > { %435 = vrot.lane.b32.xlu0 %v307_v24, %s2561_s21  ;;  %437 = vrot.lane.b32.xlu1 %v308_v26, %s2561_s21  ;;  %v271_v24 = vld [vmem:[%s2610_s23 + $0x60] sm:$0xff]  ;;  %v349_v26 = vadd.f32 -1.0, %v333_v21 }
  0x3c   : > { %v287_v27 = vmul.f32 0.2, %v271_v24  ;;  %v335_v33 = vmul.f32 4.0, %v271_v24 }
  0x3f   : > { %499 = vrot.lane.b32.xlu0 %v339_v30, %s2562_s22  ;;  %501 = vrot.lane.b32.xlu1 %v340_v32, %s2562_s22  ;;  %v303_v30 = vadd.f32 0.1, %v287_v27  ;;  %v319_v32 = vadd.f32 -39.9, %v287_v27 }
  0x43   : > { %375 = vrot.lane.b32.xlu0 %v293_v34, %s2560_s19  ;;  %377 = vrot.lane.b32.xlu1 %v294_v35, %s2560_s19  ;;  %v320_v34 = vadd.f32 -39.9, %v288_v29  ;;  %v336_v35 = vmul.f32 4.0, %v272_v25 }
  0x45   : > { %v352_v40 = vadd.f32 -1.0, %v336_v35 }
  0x47   : > { %439 = vrot.lane.b32.xlu0 %v309_v36, %s2561_s21  ;;  %441 = vrot.lane.b32.xlu1 %v310_v38, %s2561_s21  ;;  %v273_v36 = vld [vmem:[%s2610_s23 + $0x70] sm:$0xff]  ;;  %v351_v38 = vadd.f32 -1.0, %v335_v33 }
  0x48   : > { %v289_v39 = vmul.f32 0.2, %v273_v36  ;;  %v337_v45 = vmul.f32 4.0, %v273_v36 }
  0x4b   : > { %503 = vrot.lane.b32.xlu0 %v341_v42, %s2562_s22  ;;  %505 = vrot.lane.b32.xlu1 %v342_v44, %s2562_s22  ;;  %v305_v42 = vadd.f32 0.1, %v289_v39  ;;  %v321_v44 = vadd.f32 -39.9, %v289_v39 }
  0x4f   : > { %379 = vrot.lane.b32.xlu0 %v295_v46, %s2560_s19  ;;  %381 = vrot.lane.b32.xlu1 %v296_v47, %s2560_s19  ;;  %v322_v46 = vadd.f32 -39.9, %v290_v41  ;;  %v338_v47 = vmul.f32 4.0, %v274_v37  ;;  %v246_v41 = vld [vmem:[%s2605_s20 + $0x18] sm:$0xff] }
  0x51   : > { %v354_v49 = vadd.f32 -1.0, %v338_v47 }
  0x53   : > { %443 = vrot.lane.b32.xlu0 %v311_v48, %s2561_s21  ;;  %445 = vrot.lane.b32.xlu1 %v312_v50, %s2561_s21  ;;  %v353_v48 = vadd.f32 -1.0, %v337_v45 }
  0x57   : > { %507 = vrot.lane.b32.xlu0 %v343_v54, %s2562_s22  ;;  %509 = vrot.lane.b32.xlu1 %v344_v56, %s2562_s22 }
  0x5b   : > { %383 = vrot.lane.b32.xlu0 %v297_v58, %s2560_s19  ;;  %385 = vrot.lane.b32.xlu1 %v298_v59, %s2560_s19  ;;  %v648_v58 = vlaneseq }
  0x5d   : > { %v2729_v61 = vand.u32 127, %v648_v58 }
  0x5f   : > { %447 = vrot.lane.b32.xlu0 %v313_v60, %s2561_s21  ;;  %449 = vrot.lane.b32.xlu1 %v314_v62, %s2561_s21 }
  0x63   : > { %511 = vrot.lane.b32.xlu0 %v345_v2, %s2562_s22  ;;  %513 = vrot.lane.b32.xlu1 %v346_v4, %s2562_s22  ;;  %v2563_v2 = vmov 0.0  }
  0x67   : > { %387 = vrot.lane.b32.xlu0 %v299_v6, %s2560_s19  ;;  %389 = vrot.lane.b32.xlu1 %v300_v7, %s2560_s19 }
  0x6b   : > { %451 = vrot.lane.b32.xlu0 %v315_v8, %s2561_s21  ;;  %453 = vrot.lane.b32.xlu1 %v316_v10, %s2561_s21 }
  0x6f   : > { %515 = vrot.lane.b32.xlu0 %v347_v14, %s2562_s22  ;;  %517 = vrot.lane.b32.xlu1 %v348_v16, %s2562_s22  ;;  %v244_v14 = vld [vmem:[%s2605_s20 + $0x8] sm:$0xff] }
  0x73   : > { %391 = vrot.lane.b32.xlu0 %v301_v18, %s2560_s19  ;;  %393 = vrot.lane.b32.xlu1 %v302_v19, %s2560_s19 }
  0x77   : > { %455 = vrot.lane.b32.xlu0 %v317_v20, %s2561_s21  ;;  %457 = vrot.lane.b32.xlu1 %v318_v22, %s2561_s21 }
  0x7b   : > { %519 = vrot.lane.b32.xlu0 %v349_v26, %s2562_s22  ;;  %521 = vrot.lane.b32.xlu1 %v350_v28, %s2562_s22 }
  0x7f   : > { %395 = vrot.lane.b32.xlu0 %v303_v30, %s2560_s19  ;;  %397 = vrot.lane.b32.xlu1 %v304_v31, %s2560_s19 }
  0x83   : > { %459 = vrot.lane.b32.xlu0 %v319_v32, %s2561_s21  ;;  %461 = vrot.lane.b32.xlu1 %v320_v34, %s2561_s21 }
  0x87   : > { %523 = vrot.lane.b32.xlu0 %v351_v38, %s2562_s22  ;;  %525 = vrot.lane.b32.xlu1 %v352_v40, %s2562_s22 }
  0x8b   : > { %399 = vrot.lane.b32.xlu0 %v305_v42, %s2560_s19  ;;  %401 = vrot.lane.b32.xlu1 %v306_v43, %s2560_s19  ;;  %v245_v42 = vld [vmem:[%s2605_s20 + $0x10] sm:$0xff] }
  0x8f   : > { %463 = vrot.lane.b32.xlu0 %v321_v44, %s2561_s21  ;;  %465 = vrot.lane.b32.xlu1 %v322_v46, %s2561_s21 }
  0x93   : > { %527 = vrot.lane.b32.xlu0 %v353_v48, %s2562_s22  ;;  %529 = vrot.lane.b32.xlu1 %v354_v49, %s2562_s22 }
  0x96   : > { %v658_v50 = vpop.permute.xlu1 %657  ;;  %v652_v51 = vpop.permute.xlu0 %651 }
  0x97   : > { %vm698_vm1 = vcmp.eq.s32.totalorder %v652_v51, %v2729_v61  ;;  %vm700_vm3 = vcmp.eq.s32.totalorder %v658_v50, %v2729_v61 }
  0x98   : > { %v1842_v3 = vsel %vm698_vm1, 1.0, %v2563_v2  ;;  %v1844_v7 = vsel %vm700_vm3, 1.0, %v2563_v2 }
  0x9a   : > { %v661_v52 = vpop.permute.xlu1 %660  ;;  %v655_v53 = vpop.permute.xlu0 %654 }
  0x9b   : > { %vm699_vm2 = vcmp.eq.s32.totalorder %v655_v53, %v2729_v61  ;;  %vm701_vm4 = vcmp.eq.s32.totalorder %v661_v52, %v2729_v61 }
  0x9c   : > { %v1843_v6 = vsel %vm699_vm2, 1.0, %v2563_v2  ;;  %v1845_v12 = vsel %vm701_vm4, 1.0, %v2563_v2  ;;  %vm1736_vm4 = vcmask 31744  }
  0x9e   : > { %v667_v54 = vpop.permute.xlu1 %666  ;;  %v664_v55 = vpop.permute.xlu0 %663 }
  0x9f   : > { %vm702_vm7 = vcmp.eq.s32.totalorder %v664_v55, %v2729_v61  ;;  %vm703_vm9 = vcmp.eq.s32.totalorder %v667_v54, %v2729_v61 }
  0xa0   : > { %v1846_v21 = vsel %vm702_vm7, 1.0, %v2563_v2  ;;  %v1847_v30 = vsel %vm703_vm9, 1.0, %v2563_v2 }
  0xa2   : > { %v2721_v56 = vpop.permute.xlu1 %672  ;;  %v2723_v57 = vpop.permute.xlu0 %669 }
  0xa3   : > { %vm704_vm10 = vcmp.eq.s32.totalorder %v2723_v57, %v2729_v61  ;;  %vm705_vm11 = vcmp.eq.s32.totalorder %v2721_v56, %v2729_v61 }
  0xa4   : > { %v1848_v38 = vsel %vm704_vm10, 1.0, %v2563_v2  ;;  %v1849_v53 = vsel %vm705_vm11, 1.0, %v2563_v2 }
  0xa6   : > { %v2725_v59 = vpop.permute.xlu1 %678  ;;  %v2727_v60 = vpop.permute.xlu0 %675 }
  0xa7   : > { %vm706_vm12 = vcmp.eq.s32.totalorder %v2727_v60, %v2729_v61  ;;  %vm707_vm13 = vcmp.eq.s32.totalorder %v2725_v59, %v2729_v61 }
  0xaa   : > { %v2731_v62 = vpop.permute.xlu1 %684  ;;  %v2733_v63 = vpop.permute.xlu0 %681 }
  0xab   : > { %vm708_vm14 = vcmp.eq.s32.totalorder %v2733_v63, %v2729_v61  ;;  %vm709_vm15 = vcmp.eq.s32.totalorder %v2731_v62, %v2729_v61 }
  0xae   : > { %v2736_v0 = vpop.permute.xlu1 %690  ;;  %v2738_v1 = vpop.permute.xlu0 %687 }
  0xaf   : > { %vm710_vm0 = vcmp.eq.s32.totalorder %v2738_v1, %v2729_v61  ;;  %vm711_vm1 = vcmp.eq.s32.totalorder %v2736_v0, %v2729_v61 }
  0xb1   : > { %754 = vxpose.xlu0.b32.start [1/16] (narrow) %v1842_v3, 64 }
  0xb2   : > { %v2742_v4 = vpop.permute.xlu1 %696  ;;  %v2744_v5 = vpop.permute.xlu0 %693 }
  0xb3   : > { %vm712_vm2 = vcmp.eq.s32.totalorder %v2744_v5, %v2729_v61  ;;  %vm713_vm3 = vcmp.eq.s32.totalorder %v2742_v4, %v2729_v61  ;;  %v252_v4 = vld [vmem:[%s2605_s20 + $0x48] sm:$0xff] }
  0xb5   : > { %755 = vxpose.xlu0.b32.cont [2/16] (narrow) %v1843_v6, 64 }
  0xb6   : > { %v374_v8 = vpop.permute.xlu1 %373  ;;  %v372_v9 = vpop.permute.xlu0 %371 }
  0xb9   : > { %756 = vxpose.xlu0.b32.cont [3/16] (narrow) %v1844_v7, 64 }
  0xba   : > { %v438_v10 = vpop.permute.xlu1 %437  ;;  %v436_v11 = vpop.permute.xlu0 %435 }
  0xbb   : > { %v549_v13 = vsel %vm547_vm5, %v374_v8, %v438_v10  ;;  %v548_v16 = vsel %vm547_vm5, %v372_v9, %v436_v11  ;;  %v1850_v9 = vsel %vm706_vm12, 1.0, %v2563_v2 }
  0xbd   : > { %757 = vxpose.xlu0.b32.cont [4/16] (narrow) %v1845_v12, 64 }
  0xbe   : > { %v502_v17 = vpop.permute.xlu1 %501  ;;  %v500_v18 = vpop.permute.xlu0 %499 }
  0xbf   : > { %v566_v19 = vsel %vm564_vm6, %v549_v13, %v502_v17  ;;  %v565_v20 = vsel %vm564_vm6, %v548_v16, %v500_v18  ;;  %v1851_v16 = vsel %vm707_vm13, 1.0, %v2563_v2  ;;  %v248_v18 = vld [vmem:[%s2605_s20 + $0x28] sm:$0xff] }
  0xc0   : > { %v582_v22 = vsub.f32 %v244_v14, %v566_v19  ;;  %v581_v23 = vsub.f32 %v243_v15, %v565_v20  ;;  %v247_v19 = vld [vmem:[%s2605_s20 + $0x20] sm:$0xff] }
  0xc1   : > { %758 = vxpose.xlu0.b32.cont [5/16] (narrow) %v1846_v21, 64 }
  0xc2   : > { %v599_v24 = vsel %vm597_vm8, %v582_v22, 1.0  ;;  %v598_v25 = vsel %vm597_vm8, %v581_v23, 1.0  ;;  %v378_v26 = vpop.permute.xlu1 %377  ;;  %v376_v27 = vpop.permute.xlu0 %375 }
  0xc3   : > { %v790_v28 = vand.u32 4294901760, %v599_v24  ;;  %v787_v29 = vand.u32 4294901760, %v598_v25 }
  0xc5   : > { %v956_v31 = vsub.f32 %v599_v24, %v790_v28  ;;  %v2765_v32 = vpack.c.bf16 %v790_v28, %v787_v29  ;;  %v949_v33 = vsub.f32 %v598_v25, %v787_v29  ;;  %759 = vxpose.xlu0.b32.cont [6/16] (narrow) %v1847_v30, 64  ;;  %v1852_v30 = vsel %vm708_vm14, 1.0, %v2563_v2 }
  0xc6   : > { %v442_v34 = vpop.permute.xlu1 %441  ;;  %v440_v35 = vpop.permute.xlu0 %439 }
  0xc7   : > { %2271 = vmatprep.subr.bf16.mxu1 %v2765_v32  ;;  %2367 = vmatprep.subr.bf16.mxu0 %v2765_v32  ;;  %v950_v36 = vand.u32 4294901760, %v949_v33  ;;  %v957_v37 = vand.u32 4294901760, %v956_v31  ;;  %v551_v39 = vsel %vm547_vm5, %v378_v26, %v442_v34  ;;  %v2773_v40 = vpack.c.bf16 %v956_v31, %v949_v33 }
  0xc8   : > { %2273 = vmatpush3.bf16.msra.mxu1 %v2765_v32  ;;  %2369 = vmatpush3.bf16.msra.mxu0 %v2765_v32  ;;  %v550_v46 = vsel %vm547_vm5, %v376_v27, %v440_v35 }
  0xc9   : > { %760 = vxpose.xlu0.b32.cont [7/16] (narrow) %v1848_v38, 64  ;;  %v951_v43 = vsub.f32 %v949_v33, %v950_v36  ;;  %v958_v44 = vsub.f32 %v956_v31, %v957_v37  ;;  %v2779_v45 = vpack.c.bf16 %v957_v37, %v950_v36 }
  0xca   : > { %v506_v47 = vpop.permute.xlu1 %505  ;;  %v504_v48 = vpop.permute.xlu0 %503 }
  0xcb   : > { %v568_v49 = vsel %vm564_vm6, %v551_v39, %v506_v47  ;;  %v567_v50 = vsel %vm564_vm6, %v550_v46, %v504_v48  ;;  %v952_v51 = vand.u32 4294901760, %v951_v43  ;;  %v959_v52 = vand.u32 4294901760, %v958_v44 }
  0xcc   : > { %v584_v54 = vsub.f32 %v246_v41, %v568_v49  ;;  %v583_v55 = vsub.f32 %v245_v42, %v567_v50  ;;  %v1853_v41 = vsel %vm709_vm15, 1.0, %v2563_v2  ;;  %v1854_v49 = vsel %vm710_vm0, 1.0, %v2563_v2 }
  0xcd   : > { %761 = vxpose.xlu0.b32.cont [8/16] (narrow) %v1849_v53, 64  ;;  %v2787_v56 = vpack.c.bf16 %v959_v52, %v952_v51  ;;  %v250_v51 = vld [vmem:[%s2605_s20 + $0x38] sm:$0xff]  ;;  %v249_v52 = vld [vmem:[%s2605_s20 + $0x30] sm:$0xff] }
  0xce   : > { %v601_v57 = vsel %vm597_vm8, %v584_v54, 1.0  ;;  %v600_v58 = vsel %vm597_vm8, %v583_v55, 1.0  ;;  %v382_v3 = vpop.permute.xlu1 %381  ;;  %v380_v6 = vpop.permute.xlu0 %379 }
  0xcf   : > { %v796_v7 = vand.u32 4294901760, %v601_v57  ;;  %v793_v8 = vand.u32 4294901760, %v600_v58 }
  0xd1   : > { %v970_v10 = vsub.f32 %v601_v57, %v796_v7  ;;  %v2794_v11 = vpack.c.bf16 %v796_v7, %v793_v8  ;;  %v963_v60 = vsub.f32 %v600_v58, %v793_v8  ;;  %762 = vxpose.xlu0.b32.cont [9/16] (narrow) %v1850_v9, 64 }
  0xd2   : > { %v446_v12 = vpop.permute.xlu1 %445  ;;  %v444_v13 = vpop.permute.xlu0 %443 }
  0xd3   : > { %2275 = vmatprep.subr.bf16.mxu1 %v2794_v11  ;;  %2371 = vmatprep.subr.bf16.mxu0 %v2794_v11  ;;  %v964_v14 = vand.u32 4294901760, %v963_v60  ;;  %v971_v15 = vand.u32 4294901760, %v970_v10  ;;  %v553_v17 = vsel %vm547_vm5, %v382_v3, %v446_v12  ;;  %v2802_v59 = vpack.c.bf16 %v970_v10, %v963_v60 }
  0xd4   : > { %2277 = vmatpush3.bf16.msra.mxu1 %v2794_v11  ;;  %2373 = vmatpush3.bf16.msra.mxu0 %v2794_v11  ;;  %v552_v23 = vsel %vm547_vm5, %v380_v6, %v444_v13 }
  0xd5   : > { %763 = vxpose.xlu0.b32.cont [10/16] (narrow) %v1851_v16, 64  ;;  %v2808_v20 = vpack.c.bf16 %v971_v15, %v964_v14  ;;  %v965_v21 = vsub.f32 %v963_v60, %v964_v14  ;;  %v972_v22 = vsub.f32 %v970_v10, %v971_v15  ;;  %v1855_v10 = vsel %vm711_vm1, 1.0, %v2563_v2 }
  0xd6   : > { %v510_v24 = vpop.permute.xlu1 %509  ;;  %v508_v25 = vpop.permute.xlu0 %507 }
  0xd7   : > { %v570_v26 = vsel %vm564_vm6, %v553_v17, %v510_v24  ;;  %v569_v27 = vsel %vm564_vm6, %v552_v23, %v508_v25  ;;  %v966_v28 = vand.u32 4294901760, %v965_v21  ;;  %v973_v29 = vand.u32 4294901760, %v972_v22 }
  0xd8   : > { %v586_v63 = vsub.f32 %v248_v18, %v570_v26  ;;  %v585_v31 = vsub.f32 %v247_v19, %v569_v27  ;;  %v1856_v19 = vsel %vm712_vm2, 1.0, %v2563_v2  ;;  %v1857_v27 = vsel %vm713_vm3, 1.0, %v2563_v2 }
  0xd9   : > { %764 = vxpose.xlu0.b32.cont [11/16] (narrow) %v1852_v30, 64  ;;  %v2816_v33 = vpack.c.bf16 %v973_v29, %v966_v28  ;;  %v251_v29 = vld [vmem:[%s2605_s20 + $0x40] sm:$0xff] }
  0xda   : > { %v603_v34 = vsel %vm597_vm8, %v586_v63, 1.0  ;;  %v602_v35 = vsel %vm597_vm8, %v585_v31, 1.0  ;;  %v386_v36 = vpop.permute.xlu1 %385  ;;  %v384_v37 = vpop.permute.xlu0 %383 }
  0xdb   : > { %v802_v38 = vand.u32 4294901760, %v603_v34  ;;  %v799_v39 = vand.u32 4294901760, %v602_v35 }
  0xdd   : > { %v984_v42 = vsub.f32 %v603_v34, %v802_v38  ;;  %v2823_v43 = vpack.c.bf16 %v802_v38, %v799_v39  ;;  %v977_v62 = vsub.f32 %v602_v35, %v799_v39  ;;  %765 = vxpose.xlu0.b32.cont [12/16] (narrow) %v1853_v41, 64 }
  0xde   : > { %v450_v44 = vpop.permute.xlu1 %449  ;;  %v448_v46 = vpop.permute.xlu0 %447 }
  0xdf   : > { %2279 = vmatprep.subr.bf16.mxu1 %v2823_v43  ;;  %2375 = vmatprep.subr.bf16.mxu0 %v2823_v43  ;;  %v978_v47 = vand.u32 4294901760, %v977_v62  ;;  %v985_v48 = vand.u32 4294901760, %v984_v42  ;;  %v555_v50 = vsel %vm547_vm5, %v386_v36, %v450_v44  ;;  %v2831_v1 = vpack.c.bf16 %v984_v42, %v977_v62 }
  0xe0   : > { %2281 = vmatpush3.bf16.msra.mxu1 %v2823_v43  ;;  %2377 = vmatpush3.bf16.msra.mxu0 %v2823_v43  ;;  %v554_v57 = vsel %vm547_vm5, %v384_v37, %v448_v46 }
  0xe1   : > { %766 = vxpose.xlu0.b32.cont [13/16] (narrow) %v1854_v49, 64  ;;  %v2837_v53 = vpack.c.bf16 %v985_v48, %v978_v47  ;;  %v979_v54 = vsub.f32 %v977_v62, %v978_v47  ;;  %v986_v55 = vsub.f32 %v984_v42, %v985_v48 }
  0xe2   : > { %v514_v58 = vpop.permute.xlu1 %513  ;;  %v512_v3 = vpop.permute.xlu0 %511 }
  0xe3   : > { %v572_v6 = vsel %vm564_vm6, %v555_v50, %v514_v58  ;;  %v571_v7 = vsel %vm564_vm6, %v554_v57, %v512_v3  ;;  %v980_v8 = vand.u32 4294901760, %v979_v54  ;;  %v987_v9 = vand.u32 4294901760, %v986_v55 }
  0xe4   : > { %v588_v0 = vsub.f32 %v250_v51, %v572_v6  ;;  %v587_v60 = vsub.f32 %v249_v52, %v571_v7 }
  0xe5   : > { %767 = vxpose.xlu0.b32.cont [14/16] (narrow) %v1855_v10, 64  ;;  %v2845_v12 = vpack.c.bf16 %v987_v9, %v980_v8  ;;  %v254_v8 = vld [vmem:[%s2605_s20 + $0x58] sm:$0xff]  ;;  %v253_v9 = vld [vmem:[%s2605_s20 + $0x50] sm:$0xff] }
  0xe6   : > { %v605_v13 = vsel %vm597_vm8, %v588_v0, 1.0  ;;  %v604_v14 = vsel %vm597_vm8, %v587_v60, 1.0  ;;  %v390_v15 = vpop.permute.xlu1 %389  ;;  %v388_v16 = vpop.permute.xlu0 %387 }
  0xe7   : > { %v808_v17 = vand.u32 4294901760, %v605_v13  ;;  %v805_v18 = vand.u32 4294901760, %v604_v14 }
  0xe9   : > { %v998_v21 = vsub.f32 %v605_v13, %v808_v17  ;;  %v2852_v22 = vpack.c.bf16 %v808_v17, %v805_v18  ;;  %v991_v5 = vsub.f32 %v604_v14, %v805_v18  ;;  %768 = vxpose.xlu0.b32.cont [15/16] (narrow) %v1856_v19, 64 }
  0xea   : > { %v454_v23 = vpop.permute.xlu1 %453  ;;  %v452_v24 = vpop.permute.xlu0 %451 }
  0xeb   : > { %2283 = vmatprep.subr.bf16.mxu1 %v2852_v22  ;;  %2379 = vmatprep.subr.bf16.mxu0 %v2852_v22  ;;  %v992_v25 = vand.u32 4294901760, %v991_v5  ;;  %v999_v26 = vand.u32 4294901760, %v998_v21  ;;  %v557_v28 = vsel %vm547_vm5, %v390_v15, %v454_v23  ;;  %v2860_v61 = vpack.c.bf16 %v998_v21, %v991_v5 }
  0xec   : > { %2285 = vmatpush3.bf16.msra.mxu1 %v2852_v22  ;;  %2381 = vmatpush3.bf16.msra.mxu0 %v2852_v22  ;;  %v556_v34 = vsel %vm547_vm5, %v388_v16, %v452_v24 }
  0xed   : > { %769 = vxpose.xlu0.b32.end [16/16] (narrow) %v1857_v27, 64  ;;  %v2864_v30 = vpack.c.bf16 %v999_v26, %v992_v25  ;;  %v993_v63 = vsub.f32 %v991_v5, %v992_v25  ;;  %v1000_v31 = vsub.f32 %v998_v21, %v999_v26 }
  0xee   : > { %v518_v35 = vpop.permute.xlu1 %517  ;;  %v516_v36 = vpop.permute.xlu0 %515 }
  0xef   : > { %v574_v2 = vsel %vm564_vm6, %v557_v28, %v518_v35  ;;  %v573_v37 = vsel %vm564_vm6, %v556_v34, %v516_v36  ;;  %v994_v38 = vand.u32 4294901760, %v993_v63  ;;  %v1001_v39 = vand.u32 4294901760, %v1000_v31 }
  0xf0   : > { %v590_v41 = vsub.f32 %v252_v4, %v574_v2  ;;  %v589_v42 = vsub.f32 %v251_v29, %v573_v37 }
  0xf1   : > { %v2869_v62 = vpack.c.bf16 %v1001_v39, %v994_v38  ;;  %v256_v39 = vld [vmem:[%s2605_s20 + $0x68] sm:$0xff] }
  0xf2   : > { %v607_v44 = vsel %vm597_vm8, %v590_v41, 1.0  ;;  %v606_v46 = vsel %vm597_vm8, %v589_v42, 1.0  ;;  %v394_v47 = vpop.permute.xlu1 %393  ;;  %v392_v48 = vpop.permute.xlu0 %391  ;;  %v255_v41 = vld [vmem:[%s2605_s20 + $0x60] sm:$0xff] }
  0xf3   : > { %v814_v49 = vand.u32 4294901760, %v607_v44  ;;  %v811_v50 = vand.u32 4294901760, %v606_v46 }
  0xf5   : > { %v1012_v51 = vsub.f32 %v607_v44, %v814_v49  ;;  %v2873_v52 = vpack.c.bf16 %v814_v49, %v811_v50  ;;  %v1005_v54 = vsub.f32 %v606_v46, %v811_v50 }
  0xf6   : > { %v458_v55 = vpop.permute.xlu1 %457  ;;  %v456_v57 = vpop.permute.xlu0 %455 }
  0xf7   : > { %2287 = vmatprep.subr.bf16.mxu1 %v2873_v52  ;;  %2383 = vmatprep.subr.bf16.mxu0 %v2873_v52  ;;  %v1006_v58 = vand.u32 4294901760, %v1005_v54  ;;  %v1013_v3 = vand.u32 4294901760, %v1012_v51  ;;  %v559_v6 = vsel %vm547_vm5, %v394_v47, %v458_v55  ;;  %v2880_v7 = vpack.c.bf16 %v1012_v51, %v1005_v54 }
  0xf8   : > { %2289 = vmatpush3.bf16.msra.mxu1 %v2873_v52  ;;  %2385 = vmatpush3.bf16.msra.mxu0 %v2873_v52  ;;  %v558_v13 = vsel %vm547_vm5, %v392_v48, %v456_v57 }
  0xf9   : > { %v2884_v10 = vpack.c.bf16 %v1013_v3, %v1006_v58  ;;  %v1007_v0 = vsub.f32 %v1005_v54, %v1006_v58  ;;  %v1014_v60 = vsub.f32 %v1012_v51, %v1013_v3 }
  0xfa   : > { %v522_v14 = vpop.permute.xlu1 %521  ;;  %v520_v15 = vpop.permute.xlu0 %519 }
  0xfb   : > { %v576_v16 = vsel %vm564_vm6, %v559_v6, %v522_v14  ;;  %v575_v17 = vsel %vm564_vm6, %v558_v13, %v520_v15  ;;  %v1008_v18 = vand.u32 4294901760, %v1007_v0  ;;  %v1015_v19 = vand.u32 4294901760, %v1014_v60 }
  0xfc   : > { %v592_v21 = vsub.f32 %v254_v8, %v576_v16  ;;  %v591_v5 = vsub.f32 %v253_v9, %v575_v17 }
  0xfd   : > { %v2889_v23 = vpack.c.bf16 %v1015_v19, %v1008_v18 }
  0xfe   : > { %v609_v24 = vsel %vm597_vm8, %v592_v21, 1.0  ;;  %v608_v25 = vsel %vm597_vm8, %v591_v5, 1.0  ;;  %v398_v26 = vpop.permute.xlu1 %397  ;;  %v396_v27 = vpop.permute.xlu0 %395 }
  0xff   : > { %v820_v28 = vand.u32 4294901760, %v609_v24  ;;  %v817_v4 = vand.u32 4294901760, %v608_v25 }
 0x101   : > { %v1026_v29 = vsub.f32 %v609_v24, %v820_v28  ;;  %v2893_v63 = vpack.c.bf16 %v820_v28, %v817_v4  ;;  %v1019_v31 = vsub.f32 %v608_v25, %v817_v4  ;;  %v258_v25 = vld [vmem:[%s2605_s20 + $0x78] sm:$0xff] }
 0x102   : > { %v462_v34 = vpop.permute.xlu1 %461  ;;  %v460_v35 = vpop.permute.xlu0 %459 }
 0x103   : > { %2291 = vmatprep.subr.bf16.mxu1 %v2893_v63  ;;  %2387 = vmatprep.subr.bf16.mxu0 %v2893_v63  ;;  %v1020_v36 = vand.u32 4294901760, %v1019_v31  ;;  %v1027_v2 = vand.u32 4294901760, %v1026_v29  ;;  %v561_v37 = vsel %vm547_vm5, %v398_v26, %v462_v34  ;;  %v2900_v38 = vpack.c.bf16 %v1026_v29, %v1019_v31  ;;  %v257_v26 = vld [vmem:[%s2605_s20 + $0x70] sm:$0xff] }
 0x104   : > { %2293 = vmatpush3.bf16.msra.mxu1 %v2893_v63  ;;  %2389 = vmatpush3.bf16.msra.mxu0 %v2893_v63  ;;  %v560_v47 = vsel %vm547_vm5, %v396_v27, %v460_v35 }
 0x105   : > { %v2904_v42 = vpack.c.bf16 %v1027_v2, %v1020_v36  ;;  %v1021_v44 = vsub.f32 %v1019_v31, %v1020_v36  ;;  %v1028_v46 = vsub.f32 %v1026_v29, %v1027_v2 }
 0x106   : > { %v526_v48 = vpop.permute.xlu1 %525  ;;  %v524_v49 = vpop.permute.xlu0 %523 }
 0x107   : > { %v578_v50 = vsel %vm564_vm6, %v561_v37, %v526_v48  ;;  %v577_v51 = vsel %vm564_vm6, %v560_v47, %v524_v49  ;;  %v1022_v54 = vand.u32 4294901760, %v1021_v44  ;;  %v1029_v55 = vand.u32 4294901760, %v1028_v46 }
 0x108   : > { %v594_v57 = vsub.f32 %v256_v39, %v578_v50  ;;  %v593_v58 = vsub.f32 %v255_v41, %v577_v51 }
 0x109   : > { %v2909_v3 = vpack.c.bf16 %v1029_v55, %v1022_v54 }
 0x10a   : > { %v611_v6 = vsel %vm597_vm8, %v594_v57, 1.0  ;;  %v610_v8 = vsel %vm597_vm8, %v593_v58, 1.0  ;;  %v402_v9 = vpop.permute.xlu1 %401  ;;  %v400_v0 = vpop.permute.xlu0 %399 }
 0x10b   : > { %v826_v60 = vand.u32 4294901760, %v611_v6  ;;  %v823_v13 = vand.u32 4294901760, %v610_v8 }
 0x10d   : > { %v1040_v14 = vsub.f32 %v611_v6, %v826_v60  ;;  %v2913_v15 = vpack.c.bf16 %v826_v60, %v823_v13  ;;  %v1033_v16 = vsub.f32 %v610_v8, %v823_v13 }
 0x10e   : > { %v466_v17 = vpop.permute.xlu1 %465  ;;  %v464_v18 = vpop.permute.xlu0 %463 }
 0x10f   : > { %2295 = vmatprep.subr.bf16.mxu1 %v2913_v15  ;;  %2391 = vmatprep.subr.bf16.mxu0 %v2913_v15  ;;  %v1034_v19 = vand.u32 4294901760, %v1033_v16  ;;  %v1041_v21 = vand.u32 4294901760, %v1040_v14  ;;  %v563_v5 = vsel %vm547_vm5, %v402_v9, %v466_v17  ;;  %v2920_v24 = vpack.c.bf16 %v1040_v14, %v1033_v16 }
 0x110   : > { %2297 = vmatpush3.bf16.msra.mxu1 %v2913_v15  ;;  %2393 = vmatpush3.bf16.msra.mxu0 %v2913_v15  ;;  %v562_v29 = vsel %vm547_vm5, %v400_v0, %v464_v18 }
 0x111   : > { %v2924_v27 = vpack.c.bf16 %v1041_v21, %v1034_v19  ;;  %v1035_v28 = vsub.f32 %v1033_v16, %v1034_v19  ;;  %v1042_v4 = vsub.f32 %v1040_v14, %v1041_v21 }
 0x112   : > { %v530_v31 = vpop.permute.xlu1 %529  ;;  %v528_v34 = vpop.permute.xlu0 %527 }
 0x113   : > { %v580_v35 = vsel %vm564_vm6, %v563_v5, %v530_v31  ;;  %v579_v36 = vsel %vm564_vm6, %v562_v29, %v528_v34  ;;  %v1036_v2 = vand.u32 4294901760, %v1035_v28  ;;  %v1043_v37 = vand.u32 4294901760, %v1042_v4 }
 0x114   : > { %v596_v39 = vsub.f32 %v258_v25, %v580_v35  ;;  %v595_v41 = vsub.f32 %v257_v26, %v579_v36 }
 0x115   : > { %v2929_v44 = vpack.c.bf16 %v1043_v37, %v1036_v2 }
 0x116   : > { %v613_v46 = vsel %vm597_vm8, %v596_v39, 1.0  ;;  %v612_v47 = vsel %vm597_vm8, %v595_v41, 1.0 }
 0x117   : > { %v832_v48 = vand.u32 4294901760, %v613_v46  ;;  %v829_v49 = vand.u32 4294901760, %v612_v47 }
 0x119   : > { %v2933_v50 = vpack.c.bf16 %v832_v48, %v829_v49  ;;  %v2987_v2 = vsub.f32 %v612_v47, %v829_v49  ;;  %v2989_v37 = vsub.f32 %v613_v46, %v832_v48 }
 0x11b   : > { %2299 = vmatprep.subr.bf16.mxu1 %v2933_v50  ;;  %2395 = vmatprep.subr.bf16.mxu0 %v2933_v50  ;;  %v1048_v48 = vand.u32 4294901760, %v2987_v2 }
 0x11c   : > { %2301 = vmatpush3.bf16.msra.mxu1 %v2933_v50  ;;  %2397 = vmatpush3.bf16.msra.mxu0 %v2933_v50 }
 0x11d   : > { %2303 = vmatprep.subr.bf16.mxu1 %v2787_v56  ;;  %2399 = vmatprep.subr.bf16.mxu0 %v2779_v45 }
 0x131   : > { %v770_v51 = vpop.trf.xlu0 }
 0x132   : > { %v2941_v54 = vand.u32 4294901760, %v770_v51 }
 0x134   : > { %v2944_v55 = vsub.f32 %v770_v51, %v2941_v54 }
 0x135   : > { %v771_v57 = vpop.trf.xlu0 }
 0x136   : > { %v2946_v58 = vand.u32 4294901760, %v771_v57  ;;  %v869_v6 = vand.u32 4294901760, %v2944_v55 }
 0x138   : > { %v2950_v8 = vsub.f32 %v771_v57, %v2946_v58  ;;  %2170 = vmatprep.mubr.f32.mxu0 %v869_v6  ;;  %v870_v9 = vsub.f32 %v2944_v55, %v869_v6 }
 0x139   : > { %v772_v0 = vpop.trf.xlu0 }
 0x13a   : > { %v2953_v60 = vand.u32 4294901760, %v772_v0  ;;  %v871_v13 = vand.u32 4294901760, %v870_v9  ;;  %v879_v14 = vand.u32 4294901760, %v2950_v8 }
 0x13c   : > { %v2957_v16 = vsub.f32 %v772_v0, %v2953_v60  ;;  %2038 = vmatprep.mubr.f32.mxu1 %v871_v13  ;;  %2171 = vmatmul.mubr.f32.vlgmr.msra.gmra.mrb[0].mxu0 %v879_v14  ;;  %v880_v17 = vsub.f32 %v2950_v8, %v879_v14  ;;  %v1049_v0 = vsub.f32 %v2987_v2, %v1048_v48 }
 0x13d   : > { %2401 = vmatpush3.bf16.msra.mxu0 %v2779_v45  ;;  %v773_v18 = vpop.trf.xlu0 }
 0x13e   : > { %v2961_v19 = vand.u32 4294901760, %v773_v18  ;;  %2403 = vmatprep.subr.bf16.mxu0 %v2808_v20  ;;  %v881_v21 = vand.u32 4294901760, %v880_v17  ;;  %v889_v5 = vand.u32 4294901760, %v2957_v16 }
 0x140   : > { %v2966_v25 = vsub.f32 %v773_v18, %v2961_v19  ;;  %2039 = vmatmul.mubr.f32.vlgmr.msra.gmra.mrb[0].mxu1 %v881_v21  ;;  %2173 = vmatprep.mubr.f32.mxu0 %v889_v5  ;;  %v890_v26 = vsub.f32 %v2957_v16, %v889_v5  ;;  %v1050_v5 = vand.u32 4294901760, %v1049_v0 }
 0x141   : > { %2305 = vmatpush3.bf16.msra.mxu1 %v2787_v56  ;;  %2405 = vmatpush3.bf16.msra.mxu0 %v2808_v20  ;;  %v774_v45 = vpop.trf.xlu0 }
 0x142   : > { %v2971_v28 = vand.u32 4294901760, %v774_v45  ;;  %2307 = vmatprep.subr.bf16.mxu1 %v2816_v33  ;;  %2407 = vmatprep.subr.bf16.mxu0 %v2837_v53  ;;  %v891_v4 = vand.u32 4294901760, %v890_v26  ;;  %v899_v29 = vand.u32 4294901760, %v2966_v25 }
 0x144   : > { %v2977_v31 = vsub.f32 %v774_v45, %v2971_v28  ;;  %2041 = vmatprep.mubr.f32.mxu1 %v891_v4  ;;  %2174 = vmatmul.mubr.f32.gmra.mrb[2].mxu0 %v899_v29  ;;  %v900_v34 = vsub.f32 %v2966_v25, %v899_v29 }
 0x145   : > { %2309 = vmatpush3.bf16.msra.mxu1 %v2816_v33  ;;  %2409 = vmatpush3.bf16.msra.mxu0 %v2837_v53  ;;  %v775_v56 = vpop.trf.xlu0 }
 0x146   : > { %v2982_v20 = vand.u32 4294901760, %v775_v56  ;;  %2311 = vmatprep.subr.bf16.mxu1 %v2845_v12  ;;  %2411 = vmatprep.subr.bf16.mxu0 %v2864_v30  ;;  %v901_v35 = vand.u32 4294901760, %v900_v34  ;;  %v909_v36 = vand.u32 4294901760, %v2977_v31 }
 0x148   : > { %v2992_v39 = vsub.f32 %v775_v56, %v2982_v20  ;;  %2042 = vmatmul.mubr.f32.gmra.mrb[2].mxu1 %v901_v35  ;;  %2176 = vmatprep.mubr.f32.mxu0 %v909_v36  ;;  %v910_v33 = vsub.f32 %v2977_v31, %v909_v36 }
 0x149   : > { %2313 = vmatpush3.bf16.msra.mxu1 %v2845_v12  ;;  %2413 = vmatpush3.bf16.msra.mxu0 %v2864_v30  ;;  %v776_v53 = vpop.trf.xlu0  ;;  %v1055_v30 = vand.u32 4294901760, %v2989_v37 }
 0x14a   : > { %v2997_v41 = vand.u32 4294901760, %v776_v53  ;;  %2315 = vmatprep.subr.bf16.mxu1 %v2869_v62  ;;  %2415 = vmatprep.subr.bf16.mxu0 %v2884_v10  ;;  %v911_v46 = vand.u32 4294901760, %v910_v33  ;;  %v919_v47 = vand.u32 4294901760, %v2992_v39 }
 0x14b   : > { %v2426_v18 = vpack.c.bf16 %v1055_v30, %v1048_v48 }
 0x14c   : > { %v3004_v49 = vsub.f32 %v776_v53, %v2997_v41  ;;  %2044 = vmatprep.mubr.f32.mxu1 %v911_v46  ;;  %2177 = vmatmul.mubr.f32.gmra.mrb[4].mxu0 %v919_v47  ;;  %v920_v12 = vsub.f32 %v2992_v39, %v919_v47 }
 0x14d   : > { %2317 = vmatpush3.bf16.msra.mxu1 %v2869_v62  ;;  %2417 = vmatpush3.bf16.msra.mxu0 %v2884_v10  ;;  %v777_v51 = vpop.trf.xlu0  ;;  %v1056_v10 = vsub.f32 %v2989_v37, %v1055_v30 }
 0x14e   : > { %v3010_v57 = vand.u32 4294901760, %v777_v51  ;;  %2319 = vmatprep.subr.bf16.mxu1 %v2889_v23  ;;  %2419 = vmatprep.subr.bf16.mxu0 %v2904_v42  ;;  %v921_v6 = vand.u32 4294901760, %v920_v12  ;;  %v929_v9 = vand.u32 4294901760, %v3004_v49 }
 0x14f   : > { %v1057_v26 = vand.u32 4294901760, %v1056_v10 }
 0x150   : > { %v3017_v13 = vsub.f32 %v777_v51, %v3010_v57  ;;  %2045 = vmatmul.mubr.f32.gmra.mrb[4].mxu1 %v921_v6  ;;  %2179 = vmatprep.mubr.f32.mxu0 %v929_v9  ;;  %v930_v62 = vsub.f32 %v3004_v49, %v929_v9 }
 0x151   : > { %2321 = vmatpush3.bf16.msra.mxu1 %v2889_v23  ;;  %2421 = vmatpush3.bf16.msra.mxu0 %v2904_v42  ;;  %v2330_v42 = vpack.c.bf16 %v1057_v26, %v1050_v5 }
 0x152   : > { %2323 = vmatprep.subr.bf16.mxu1 %v2909_v3  ;;  %2423 = vmatprep.subr.bf16.mxu0 %v2924_v27  ;;  %v931_v14 = vand.u32 4294901760, %v930_v62  ;;  %v939_v17 = vand.u32 4294901760, %v3017_v13 }
 0x154   : > { %2047 = vmatprep.mubr.f32.mxu1 %v931_v14  ;;  %2180 = vmatmul.mubr.f32.gmra.mrb[6].mxu0 %v939_v17  ;;  %v940_v21 = vsub.f32 %v3017_v13, %v939_v17 }
 0x155   : > { %2325 = vmatpush3.bf16.msra.mxu1 %v2909_v3  ;;  %2425 = vmatpush3.bf16.msra.mxu0 %v2924_v27 }
 0x156   : > { %2327 = vmatprep.subr.bf16.mxu1 %v2929_v44  ;;  %2427 = vmatprep.subr.bf16.mxu0 %v2426_v18  ;;  %v941_v23 = vand.u32 4294901760, %v940_v21 }
 0x157   : > { %2214 = vmatprep.mubr.f32.mxu0 %v2941_v54 }
 0x158   : > { %2048 = vmatmul.mubr.f32.gmra.mrb[6].mxu1 %v941_v23 }
 0x159   : > { %2329 = vmatpush3.bf16.msra.mxu1 %v2929_v44  ;;  %2429 = vmatpush3.bf16.msra.mxu0 %v2426_v18 }
 0x15a   : > { %2331 = vmatprep.subr.bf16.mxu1 %v2330_v42  ;;  %2082 = vmatprep.mubr.f32.mxu1 %v2941_v54 }
 0x15b   : > { %2431 = vmatprep.subr.bf16.mxu0 %v2765_v32 }
 0x15c   : > { %2215 = vmatmul.mubr.f32.vlgmr.msra.gmra.mrb[0].mxu0 %v2946_v58 }
 0x15d   : > { %2333 = vmatpush3.bf16.msra.mxu1 %v2330_v42  ;;  %2217 = vmatprep.mubr.f32.mxu0 %v2953_v60 }
 0x15e   : > { %2433 = vmatpush3.bf16.msra.mxu0 %v2765_v32  ;;  %2335 = vmatprep.subr.bf16.mxu1 %v2773_v40  ;;  %v2362_v32 = vpack.c.bf16 %v2989_v37, %v2987_v2  ;;  %v752_v2 = vld [vmem:[%s3163_s3 + $0x30] sm:$0xff] }
 0x15f   : > { %2435 = vmatprep.subr.bf16.mxu0 %v2794_v11 }
 0x160   : > { %2083 = vmatmul.mubr.f32.vlgmr.msra.gmra.mrb[0].mxu1 %v2946_v58  ;;  %2218 = vmatmul.mubr.f32.gmra.mrb[2].mxu0 %v2961_v19 }
 0x161   : > { %2085 = vmatprep.mubr.f32.mxu1 %v2953_v60  ;;  %2337 = vmatpush3.bf16.msra.mxu1 %v2773_v40 }
 0x162   : > { %2220 = vmatprep.mubr.f32.mxu0 %v2971_v28  ;;  %2437 = vmatpush3.bf16.msra.mxu0 %v2794_v11 }
 0x163   : > { %2339 = vmatprep.subr.bf16.mxu1 %v2802_v59  ;;  %2439 = vmatprep.subr.bf16.mxu0 %v2823_v43 }
 0x164   : > { %2086 = vmatmul.mubr.f32.gmra.mrb[2].mxu1 %v2961_v19  ;;  %2221 = vmatmul.mubr.f32.gmra.mrb[4].mxu0 %v2982_v20 }
 0x165   : > { %2088 = vmatprep.mubr.f32.mxu1 %v2971_v28  ;;  %2341 = vmatpush3.bf16.msra.mxu1 %v2802_v59  ;;  %v747_v59 = vld [vmem:[%s3163_s3 + $0x8] sm:$0xff] }
 0x166   : > { %2223 = vmatprep.mubr.f32.mxu0 %v2997_v41  ;;  %2441 = vmatpush3.bf16.msra.mxu0 %v2823_v43 }
 0x167   : > { %2343 = vmatprep.subr.bf16.mxu1 %v2831_v1  ;;  %2443 = vmatprep.subr.bf16.mxu0 %v2852_v22 }
 0x168   : > { %2089 = vmatmul.mubr.f32.gmra.mrb[4].mxu1 %v2982_v20  ;;  %2224 = vmatmul.mubr.f32.gmra.mrb[6].mxu0 %v3010_v57 }
 0x169   : > { %2091 = vmatprep.mubr.f32.mxu1 %v2997_v41  ;;  %2345 = vmatpush3.bf16.msra.mxu1 %v2831_v1 }
 0x16a   : > { %2445 = vmatpush3.bf16.msra.mxu0 %v2852_v22  ;;  %2258 = vmatprep.mubr.f32.mxu0 %v2941_v54 }
 0x16b   : > { %2347 = vmatprep.subr.bf16.mxu1 %v2860_v61  ;;  %2447 = vmatprep.subr.bf16.mxu0 %v2873_v52 }
 0x16c   : > { %2092 = vmatmul.mubr.f32.gmra.mrb[6].mxu1 %v3010_v57 }
 0x16d   : > { %2349 = vmatpush3.bf16.msra.mxu1 %v2860_v61  ;;  %2126 = vmatprep.mubr.f32.mxu1 %v2944_v55  ;;  %v746_v61 = vld [vmem:[%s3163_s3] sm:$0xff] }
 0x16e   : > { %2449 = vmatpush3.bf16.msra.mxu0 %v2873_v52  ;;  %2351 = vmatprep.subr.bf16.mxu1 %v2880_v7 }
 0x16f   : > { %2451 = vmatprep.subr.bf16.mxu0 %v2893_v63 }
 0x171   : > { %2353 = vmatpush3.bf16.msra.mxu1 %v2880_v7 }
 0x172   : > { %2453 = vmatpush3.bf16.msra.mxu0 %v2893_v63  ;;  %2355 = vmatprep.subr.bf16.mxu1 %v2900_v38 }
 0x173   : > { %2455 = vmatprep.subr.bf16.mxu0 %v2913_v15 }
 0x175   : > { %2357 = vmatpush3.bf16.msra.mxu1 %v2900_v38 }
 0x176   : > { %2457 = vmatpush3.bf16.msra.mxu0 %v2913_v15  ;;  %2359 = vmatprep.subr.bf16.mxu1 %v2920_v24  ;;  %v749_v15 = vld [vmem:[%s3163_s3 + $0x18] sm:$0xff] }
 0x177   : > { %2459 = vmatprep.subr.bf16.mxu0 %v2933_v50 }
 0x179   : > { %2361 = vmatpush3.bf16.msra.mxu1 %v2920_v24 }
 0x17a   : > { %2461 = vmatpush3.bf16.msra.mxu0 %v2933_v50  ;;  %2363 = vmatprep.subr.bf16.mxu1 %v2362_v32  ;;  %v748_v50 = vld [vmem:[%s3163_s3 + $0x10] sm:$0xff] }
 0x17d   : > { %2259 = vmatmul.mubr.f32.vlgmr.msra.gmra.mrb[0].mxu0 %v2946_v58  ;;  %2365 = vmatpush3.bf16.msra.mxu1 %v2362_v32 }
 0x17e   : > { %2261 = vmatprep.mubr.f32.mxu0 %v2953_v60 }
 0x180   : > { %2127 = vmatmul.mubr.f32.vlgmr.msra.gmra.mrb[0].mxu1 %v2950_v8 }
 0x181   : > { %2262 = vmatmul.mubr.f32.gmra.mrb[2].mxu0 %v2961_v19  ;;  %2129 = vmatprep.mubr.f32.mxu1 %v2957_v16  ;;  %v751_v16 = vld [vmem:[%s3163_s3 + $0x28] sm:$0xff] }
 0x182   : > { %2264 = vmatprep.mubr.f32.mxu0 %v2971_v28  ;;  %v750_v28 = vld [vmem:[%s3163_s3 + $0x20] sm:$0xff] }
 0x184   : > { %2130 = vmatmul.mubr.f32.gmra.mrb[2].mxu1 %v2966_v25 }
 0x185   : > { %2265 = vmatmul.mubr.f32.gmra.mrb[4].mxu0 %v2982_v20  ;;  %2132 = vmatprep.mubr.f32.mxu1 %v2977_v31  ;;  %v753_v20 = vld [vmem:[%s3163_s3 + $0x38] sm:$0xff] }
 0x186   : > { %2267 = vmatprep.mubr.f32.mxu0 %v2997_v41 }
 0x188   : > { %2133 = vmatmul.mubr.f32.gmra.mrb[4].mxu1 %v2992_v39 }
 0x189   : > { %2268 = vmatmul.mubr.f32.gmra.mrb[6].mxu0 %v3010_v57  ;;  %2135 = vmatprep.mubr.f32.mxu1 %v3004_v49 }
 0x18c   : > { %2136 = vmatmul.mubr.f32.gmra.mrb[6].mxu1 %v3017_v13 }
 0x250   : > { %v2260_v40 = vpop.f32.mrb[0].mxu0 }
 0x251   : > { %v1682_v11 = vpop.f32.mrb[1].mxu0 }
 0x253   : > { %v2128_v43 = vpop.f32.mrb[0].mxu1 }
 0x254   : > { %v2462_v1 = vadd.f32 %v2260_v40, %v2128_v43  ;;  %v2263_v22 = vpop.f32.mrb[2].mxu0  ;;  %v1240_v52 = vpop.f32.mrb[1].mxu1 }
 0x255   : > { %v2463_v7 = vadd.f32 %v1682_v11, %v1240_v52  ;;  %v1694_v63 = vpop.f32.mrb[3].mxu0 }
 0x256   : > { %v1729_v38 = vadd.f32 %v2462_v1, %v747_v59 }
 0x257   : > { %v1728_v3 = vadd.f32 %v2463_v7, %v746_v61  ;;  %v2131_v24 = vpop.f32.mrb[2].mxu1 }
 0x258   : > { %1738 = vst.msk [vmem:[%s3163_s3 + $0x8] sm:$0xff] %vm1736_vm4, %v1729_v38  ;;  %v2464_v27 = vadd.f32 %v2263_v22, %v2131_v24  ;;  %v2266_v44 = vpop.f32.mrb[4].mxu0  ;;  %v1254_v54 = vpop.f32.mrb[3].mxu1 }
 0x259   : > { %1737 = vst.msk [vmem:[%s3163_s3] sm:$0xff] %vm1736_vm4, %v1728_v3  ;;  %v2465_v55 = vadd.f32 %v1694_v63, %v1254_v54  ;;  %v1706_v58 = vpop.f32.mrb[5].mxu0 }
 0x25a   : > { %v1731_v8 = vadd.f32 %v2464_v27, %v749_v15 }
 0x25b   : > { %v1730_v60 = vadd.f32 %v2465_v55, %v748_v50  ;;  %v2134_v19 = vpop.f32.mrb[4].mxu1 }
 0x25c   : > { %1740 = vst.msk [vmem:[%s3163_s3 + $0x18] sm:$0xff] %vm1736_vm4, %v1731_v8  ;;  %v2466_v25 = vadd.f32 %v2266_v44, %v2134_v19  ;;  %v2269_v45 = vpop.f32.mrb[6].mxu0  ;;  %v1268_v4 = vpop.f32.mrb[5].mxu1 }
 0x25d   : > { %1739 = vst.msk [vmem:[%s3163_s3 + $0x10] sm:$0xff] %vm1736_vm4, %v1730_v60  ;;  %v2467_v29 = vadd.f32 %v1706_v58, %v1268_v4  ;;  %v1718_v31 = vpop.f32.mrb[7].mxu0 }
 0x25e   : > { %v1733_v34 = vadd.f32 %v2466_v25, %v751_v16 }
 0x25f   : > { %v1732_v56 = vadd.f32 %v2467_v29, %v750_v28  ;;  %v2137_v35 = vpop.f32.mrb[6].mxu1 }
 0x260   : > { %1742 = vst.msk [vmem:[%s3163_s3 + $0x28] sm:$0xff] %vm1736_vm4, %v1733_v34  ;;  %v2468_v36 = vadd.f32 %v2269_v45, %v2137_v35  ;;  %v1282_v37 = vpop.f32.mrb[7].mxu1 }
 0x261   : > { %1741 = vst.msk [vmem:[%s3163_s3 + $0x20] sm:$0xff] %vm1736_vm4, %v1732_v56  ;;  %v2469_v39 = vadd.f32 %v1718_v31, %v1282_v37 }
 0x262   : > { %v1735_v33 = vadd.f32 %v2468_v36, %v753_v20 }
 0x263   : > { %v1734_v53 = vadd.f32 %v2469_v39, %v752_v2 }
 0x264   : > { %1744 = vst.msk [vmem:[%s3163_s3 + $0x38] sm:$0xff] %vm1736_vm4, %v1735_v33 }
 0x265   : > { %1743 = vst.msk [vmem:[%s3163_s3 + $0x30] sm:$0xff] %vm1736_vm4, %v1734_v53 }
 0x266 PF: > { %s13_s14 = sadd.s32 1, %s2556_s14   ;;  %s3164_s12 = smov %s2552_s13 }
 0x267   : > { %p10_p6 = scmp.ge.s32.totalorder %s13_s14, 4   ;;  %s3165_s13 = smov %s3167_s15 }
 0x269   :  { %12 = sbr.rel (!%p10_p6) target bundleno = 2 (0x2), region = 72 }

</bundles_post_ra>
